<compile_context>
chip_gen: v7x
topology: tpu7x:2x2x1
jax: 0.10.0
libtpu: 0.0.40
codegen_flags: <defaults>
</compile_context>

<pallas_src>
import functools
import math

import jax
import jax.numpy as jnp
from jax.experimental import pallas as pl
from jax.experimental.pallas import tpu as pltpu


def _layernorm_kernel(*refs, eps, inv_d, inv_dm1, has_residual, folded):
    """One grid step normalizes a (block_rows, lane_d) slab of flattened rows.

    Ref order: x, [residual], gamma, beta, [seg, segT], out.
    folded=True: lane_d = k*D and each row holds k independent length-D
    segments; per-segment statistics go through tiny indicator matmuls so the
    lane axis stays 128-dense even when D < 128.
    """
    i = 0
    x_ref = refs[i]; i += 1
    r_ref = None
    if has_residual:
        r_ref = refs[i]; i += 1
    g_ref = refs[i]; i += 1
    b_ref = refs[i]; i += 1
    e_ref = et_ref = None
    if folded:
        e_ref = refs[i]; i += 1      # (k*D, k) segment indicator
        et_ref = refs[i]; i += 1     # (k, k*D) its transpose
    o_ref = refs[-1]

    x = x_ref[...].astype(jnp.float32)
    if has_residual:
        x = x + r_ref[...].astype(jnp.float32)        # fused residual add

    if folded:
        e = e_ref[...]
        s = jnp.dot(x, e, preferred_element_type=jnp.float32)       # (br, k)
        sq = jnp.dot(x * x, e, preferred_element_type=jnp.float32)  # (br, k)
    else:
        s = jnp.sum(x, axis=-1, keepdims=True)                      # (br, 1)
        sq = jnp.sum(x * x, axis=-1, keepdims=True)                 # (br, 1)

    mean = s * inv_d
    # torch.std() default is unbiased (ddof=1): var = (sumsq - sum^2/D)/(D-1)
    var = jnp.maximum(sq - s * mean, 0.0) * inv_dm1
    denom = jnp.sqrt(var) + eps
    inv = pl.reciprocal(denom, approx=True)           # EUP slot (VALU stays free)
    inv = inv * (2.0 - denom * inv)                   # 1 NR step -> f32 accuracy

    if folded:
        et = et_ref[...]
        mean = jnp.dot(mean, et, preferred_element_type=jnp.float32)  # (br, kD)
        inv = jnp.dot(inv, et, preferred_element_type=jnp.float32)    # (br, kD)

    y = (x - mean) * inv * g_ref[...] + b_ref[...]
    o_ref[...] = y.astype(o_ref.dtype)


def _vmem_budget():
    """(vmem_limit_bytes, target f32 bytes per input block) per TPU generation."""
    kind = ""
    try:
        kind = jax.devices()[0].device_kind.lower()
    except Exception:
        pass
    if "v7" in kind or "7x" in kind:
        # 64 MiB VMEM/TC: 4x block (in+out, double-buffered) + temps must fit.
        return 40 * (1 << 20), 6 * (1 << 20)
    if "v5" in kind or "v6" in kind:
        # 128 MiB physical VMEM; default scoped limit is much lower, so raise it.
        return 64 * (1 << 20), 8 * (1 << 20)
    return 32 * (1 << 20), 4 * (1 << 20)


def _choose_block_rows(rows, lane_d, target_bytes):
    """Multiple-of-8 row block ~target_bytes of f32, >=2 grid steps, br | rows."""
    if rows <= 8:
        return rows
    br = max(8, (target_bytes // (lane_d * 4)) // 8 * 8)
    if br >= rows:
        # Keep at least 2 grid steps so the v7x megacore can split the row axis.
        br = max(8, (rows // 2) // 8 * 8)
    br = min(br, rows)
    if rows % br != 0:
        # Prefer an exact divisor (dense pipeline, no ragged/masked tail), but
        # never shrink below half the byte target.
        for cand in range(br, max(8, br // 2) - 1, -8):
            if rows % cand == 0:
                return cand
    return br


def layer_norm(x, gamma, beta, *, residual=None, eps=1e-6, block_rows=None):
    """PyTorch-module LayerNorm semantics: a_2*(x-mean)/(std+eps)+b_2.

    Optionally fuses a residual add (x + residual) before normalization so the
    add does not cost a separate HBM pass.  bf16 in/out is supported; compute
    is f32 inside the kernel.
    """
    orig_shape = x.shape
    d = int(orig_shape[-1])
    rows = int(math.prod(orig_shape[:-1])) if len(orig_shape) > 1 else 1
    x2 = x.reshape(rows, d)
    r2 = None
    if residual is not None:
        assert residual.shape == x.shape
        r2 = residual.reshape(rows, d)

    # Lane-dense folding for small d_model: pack k = 128/D rows per lane row.
    k = 1
    if d < 128 and 128 % d == 0 and rows % (128 // d) == 0:
        k = 128 // d
    folded = k > 1
    lane_d = k * d
    rows_f = rows // k

    xk = x2.reshape(rows_f, lane_d)
    rk = r2.reshape(rows_f, lane_d) if r2 is not None else None
    g = jnp.tile(gamma.reshape(1, d).astype(jnp.float32), (1, k))
    b = jnp.tile(beta.reshape(1, d).astype(jnp.float32), (1, k))

    vmem_limit, target_bytes = _vmem_budget()
    if block_rows is not None:
        br = min(int(block_rows), rows_f)
        if br < rows_f and br % 8 != 0:
            br = min(rows_f, max(8, (br // 8) * 8))
    else:
        br = _choose_block_rows(rows_f, lane_d, target_bytes)
    grid = (pl.cdiv(rows_f, br),)

    has_residual = rk is not None
    kernel = functools.partial(
        _layernorm_kernel,
        eps=float(eps),
        inv_d=1.0 / d,
        inv_dm1=1.0 / max(d - 1, 1),
        has_residual=has_residual,
        folded=folded,
    )

    in_specs = [pl.BlockSpec((br, lane_d), lambda i: (i, 0))]
    inputs = [xk]
    if has_residual:
        in_specs.append(pl.BlockSpec((br, lane_d), lambda i: (i, 0)))
        inputs.append(rk)
    in_specs += [pl.BlockSpec((1, lane_d), lambda i: (0, 0)),
                 pl.BlockSpec((1, lane_d), lambda i: (0, 0))]
    inputs += [g, b]
    if folded:
        seg = jnp.repeat(jnp.eye(k, dtype=jnp.float32), d, axis=0)   # (k*d, k)
        in_specs += [pl.BlockSpec((lane_d, k), lambda i: (0, 0)),
                     pl.BlockSpec((k, lane_d), lambda i: (0, 0))]
        inputs += [seg, seg.T]

    out = pl.pallas_call(
        kernel,
        out_shape=jax.ShapeDtypeStruct((rows_f, lane_d), x.dtype),
        grid=grid,
        in_specs=in_specs,
        out_specs=pl.BlockSpec((br, lane_d), lambda i: (i, 0)),
        compiler_params=pltpu.CompilerParams(
            dimension_semantics=("parallel",),      # rows are independent
            vmem_limit_bytes=vmem_limit,
        ),
    )(*inputs)
    return out.reshape(orig_shape)


def encoder_forward(x, mask, layers, gamma, beta, *, eps=1e-6):
    """Encoder.forward: apply the layer stack, then the final (Pallas) LayerNorm."""
    # TODO(synk): EncoderLayer is not defined in the provided spec; `layers` are
    # user-supplied JAX callables (x, mask) -> x applied sequentially here, and
    # the final LayerNorm (optionally fused with the last residual add via the
    # `residual=` argument of layer_norm) is lowered to Pallas.
    for layer in layers:
        x = layer(x, mask)
    return layer_norm(x, gamma, beta, eps=eps)


if __name__ == "__main__":
    # Small deterministic example consistent with the module: batch=2, seq=8,
    # d_model=32 (exercises the lane-folded path), plus d_model=128 for the
    # whole-row path, a bf16 HBM-boundary path and the fused-residual path.
    B, S, D = 2, 8, 32
    EPS = 1e-6

    key = jax.random.PRNGKey(0)
    kx, kg, kb, kr, kg2, kb2 = jax.random.split(key, 6)
    x = jax.random.normal(kx, (B, S, D), dtype=jnp.float32)
    mask = jnp.ones((B, 1, S), dtype=jnp.float32)
    gamma = 1.0 + 0.1 * jax.random.normal(kg, (D,), dtype=jnp.float32)  # a_2
    beta = 0.1 * jax.random.normal(kb, (D,), dtype=jnp.float32)         # b_2

    def ref_ln(xv, g, bta, d):
        mean = jnp.mean(xv, axis=-1, keepdims=True)
        var = jnp.sum((xv - mean) ** 2, axis=-1, keepdims=True) / (d - 1)
        return g * (xv - mean) / (jnp.sqrt(var) + EPS) + bta

    # 1) Encoder forward with N=0 layers (EncoderLayer unspecified) + Pallas LN.
    out = jax.block_until_ready(
        encoder_forward(x, mask, layers=(), gamma=gamma, beta=beta, eps=EPS))
    ref = ref_ln(x, gamma, beta, D)
    assert jnp.allclose(out, ref, atol=2e-5, rtol=2e-5), "encoder LayerNorm mismatch"

    # 2) D=128 whole-row path with an explicit multi-step grid (block_rows=8).
    D2 = 128
    x2 = jax.random.normal(kr, (B, S, D2), dtype=jnp.float32)
    g2 = 1.0 + 0.1 * jax.random.normal(kg2, (D2,), dtype=jnp.float32)
    b2 = 0.1 * jax.random.normal(kb2, (D2,), dtype=jnp.float32)
    out2 = jax.block_until_ready(layer_norm(x2, g2, b2, eps=EPS, block_rows=8))
    assert jnp.allclose(out2, ref_ln(x2, g2, b2, D2), atol=2e-5, rtol=2e-5), \
        "tiled LayerNorm mismatch"

    # 3) bf16 at the HBM boundary (compute stays f32 inside the kernel).
    x_bf = x.astype(jnp.bfloat16)
    out_bf = jax.block_until_ready(layer_norm(x_bf, gamma, beta, eps=EPS))
    ref_bf = ref_ln(x_bf.astype(jnp.float32), gamma, beta, D)
    assert jnp.allclose(out_bf.astype(jnp.float32), ref_bf, atol=3e-2, rtol=3e-2), \
        "bf16 LayerNorm mismatch"

    # 4) Fused residual add + LayerNorm (one HBM pass instead of two).
    r = 0.5 * jax.random.normal(kr, (B, S, D), dtype=jnp.float32)
    out_res = jax.block_until_ready(
        layer_norm(x, gamma, beta, residual=r, eps=EPS))
    assert jnp.allclose(out_res, ref_ln(x + r, gamma, beta, D),
                        atol=2e-5, rtol=2e-5), "fused residual LayerNorm mismatch"

    print("KERNEL_OK")
</pallas_src>

<mosaic_0001>
module attributes {stable_mosaic.version = 11 : i64} {
  func.func @_layernorm_kernel(%arg0: i32, %arg1: memref<4x128xf32, #tpu.memory_space<vmem>>, %arg2: memref<1x128xf32, #tpu.memory_space<vmem>>, %arg3: memref<1x128xf32, #tpu.memory_space<vmem>>, %arg4: memref<128x4xf32, #tpu.memory_space<vmem>>, %arg5: memref<4x128xf32, #tpu.memory_space<vmem>>, %arg6: memref<4x128xf32, #tpu.memory_space<vmem>>) attributes {dimension_semantics = [#tpu.dimension_semantics<parallel>], iteration_bounds = array<i64: 1>, scalar_prefetch = 0 : i64, scratch_operands = 0 : i64, tpu.core_type = #tpu.core_type<tc>, window_params = [{transform_indices = @transform_0, window_bounds = array<i64: 4, 128>}, {pipeline_mode = #tpu.pipeline_mode<synchronous>, transform_indices = @transform_1, window_bounds = array<i64: 1, 128>}, {pipeline_mode = #tpu.pipeline_mode<synchronous>, transform_indices = @transform_2, window_bounds = array<i64: 1, 128>}, {pipeline_mode = #tpu.pipeline_mode<synchronous>, transform_indices = @transform_3, window_bounds = array<i64: 128, 4>}, {pipeline_mode = #tpu.pipeline_mode<synchronous>, transform_indices = @transform_4, window_bounds = array<i64: 4, 128>}, {transform_indices = @transform_5, window_bounds = array<i64: 4, 128>}]} {
    %c0 = arith.constant 0 : index
    %c0_0 = arith.constant 0 : index
    %0 = vector.load %arg1[%c0, %c0_0] : memref<4x128xf32, #tpu.memory_space<vmem>>, vector<4x128xf32>
    %c0_1 = arith.constant 0 : index
    %c0_2 = arith.constant 0 : index
    %1 = vector.load %arg4[%c0_1, %c0_2] : memref<128x4xf32, #tpu.memory_space<vmem>>, vector<128x4xf32>
    %cst = arith.constant dense<0.000000e+00> : vector<4x4xf32>
    %2 = tpu.matmul %0, %1, %cst {dimension_numbers = #tpu.dot_dimension_numbers<[1], [0], [0], [1], [0, 0, 1, 1], [], []>} : vector<4x128xf32>, vector<128x4xf32>, vector<4x4xf32> -> vector<4x4xf32>
    %3 = arith.mulf %0, %0 : vector<4x128xf32>
    %cst_3 = arith.constant dense<0.000000e+00> : vector<4x4xf32>
    %4 = tpu.matmul %3, %1, %cst_3 {dimension_numbers = #tpu.dot_dimension_numbers<[1], [0], [0], [1], [0, 0, 1, 1], [], []>} : vector<4x128xf32>, vector<128x4xf32>, vector<4x4xf32> -> vector<4x4xf32>
    %cst_4 = arith.constant 3.125000e-02 : f32
    %5 = vector.broadcast %cst_4 : f32 to vector<4x4xf32>
    %6 = arith.mulf %2, %5 : vector<4x4xf32>
    %7 = arith.mulf %2, %6 : vector<4x4xf32>
    %8 = arith.subf %4, %7 : vector<4x4xf32>
    %cst_5 = arith.constant 0.000000e+00 : f32
    %9 = vector.broadcast %cst_5 : f32 to vector<4x4xf32>
    %10 = arith.maximumf %8, %9 : vector<4x4xf32>
    %cst_6 = arith.constant 0.0322580636 : f32
    %11 = vector.broadcast %cst_6 : f32 to vector<4x4xf32>
    %12 = arith.mulf %10, %11 : vector<4x4xf32>
    %13 = math.sqrt %12 : vector<4x4xf32>
    %cst_7 = arith.constant 9.99999997E-7 : f32
    %14 = vector.broadcast %cst_7 : f32 to vector<4x4xf32>
    %15 = arith.addf %13, %14 : vector<4x4xf32>
    %16 = tpu.reciprocal %15 {approx = true} : vector<4x4xf32> -> vector<4x4xf32>
    %17 = arith.mulf %15, %16 : vector<4x4xf32>
    %cst_8 = arith.constant 2.000000e+00 : f32
    %18 = vector.broadcast %cst_8 : f32 to vector<4x4xf32>
    %19 = arith.subf %18, %17 : vector<4x4xf32>
    %20 = arith.mulf %16, %19 : vector<4x4xf32>
    %c0_9 = arith.constant 0 : index
    %c0_10 = arith.constant 0 : index
    %21 = vector.load %arg5[%c0_9, %c0_10] : memref<4x128xf32, #tpu.memory_space<vmem>>, vector<4x128xf32>
    %cst_11 = arith.constant dense<0.000000e+00> : vector<4x128xf32>
    %22 = tpu.matmul %6, %21, %cst_11 {dimension_numbers = #tpu.dot_dimension_numbers<[1], [0], [0], [1], [0, 0, 1, 1], [], []>} : vector<4x4xf32>, vector<4x128xf32>, vector<4x128xf32> -> vector<4x128xf32>
    %cst_12 = arith.constant dense<0.000000e+00> : vector<4x128xf32>
    %23 = tpu.matmul %20, %21, %cst_12 {dimension_numbers = #tpu.dot_dimension_numbers<[1], [0], [0], [1], [0, 0, 1, 1], [], []>} : vector<4x4xf32>, vector<4x128xf32>, vector<4x128xf32> -> vector<4x128xf32>
    %24 = arith.subf %0, %22 : vector<4x128xf32>
    %25 = arith.mulf %24, %23 : vector<4x128xf32>
    %c0_13 = arith.constant 0 : index
    %c0_14 = arith.constant 0 : index
    %26 = vector.load %arg2[%c0_13, %c0_14] : memref<1x128xf32, #tpu.memory_space<vmem>>, vector<1x128xf32>
    %27 = vector.broadcast %26 : vector<1x128xf32> to vector<4x128xf32>
    %28 = arith.mulf %25, %27 : vector<4x128xf32>
    %c0_15 = arith.constant 0 : index
    %c0_16 = arith.constant 0 : index
    %29 = vector.load %arg3[%c0_15, %c0_16] : memref<1x128xf32, #tpu.memory_space<vmem>>, vector<1x128xf32>
    %30 = vector.broadcast %29 : vector<1x128xf32> to vector<4x128xf32>
    %31 = arith.addf %28, %30 : vector<4x128xf32>
    %c0_17 = arith.constant 0 : index
    %c0_18 = arith.constant 0 : index
    %32 = vector.load %arg6[%c0_17, %c0_18] : memref<4x128xf32, #tpu.memory_space<vmem>>, vector<4x128xf32>
    tpu.vector_store %arg6[%c0_17, %c0_18], %31 {strides = array<i32>} : memref<4x128xf32, #tpu.memory_space<vmem>>, vector<4x128xf32>,
    return
  }
  func.func @transform_0(%arg0: i32) -> (i32, i32) {
    %c0_i32 = arith.constant 0 : i32
    %c0_i32_0 = arith.constant 0 : i32
    return %arg0, %c0_i32 : i32, i32
  }
  func.func @transform_1(%arg0: i32) -> (i32, i32) {
    %c0_i32 = arith.constant 0 : i32
    %c0_i32_0 = arith.constant 0 : i32
    %c0_i32_1 = arith.constant 0 : i32
    return %c0_i32, %c0_i32_0 : i32, i32
  }
  func.func @transform_2(%arg0: i32) -> (i32, i32) {
    %c0_i32 = arith.constant 0 : i32
    %c0_i32_0 = arith.constant 0 : i32
    %c0_i32_1 = arith.constant 0 : i32
    return %c0_i32, %c0_i32_0 : i32, i32
  }
  func.func @transform_3(%arg0: i32) -> (i32, i32) {
    %c0_i32 = arith.constant 0 : i32
    %c0_i32_0 = arith.constant 0 : i32
    %c0_i32_1 = arith.constant 0 : i32
    return %c0_i32, %c0_i32_0 : i32, i32
  }
  func.func @transform_4(%arg0: i32) -> (i32, i32) {
    %c0_i32 = arith.constant 0 : i32
    %c0_i32_0 = arith.constant 0 : i32
    %c0_i32_1 = arith.constant 0 : i32
    return %c0_i32, %c0_i32_0 : i32, i32
  }
  func.func @transform_5(%arg0: i32) -> (i32, i32) {
    %c0_i32 = arith.constant 0 : i32
    %c0_i32_0 = arith.constant 0 : i32
    return %arg0, %c0_i32 : i32, i32
  }
}

</mosaic_0001>

<bundles_post_ra>
// kernel: tpu_custom_call.1
= control target key start
LH: loop header
LB: loop body
LE: loop exit
PB: predicated region body
PF: predicated region fallthrough
CT: control target
= control target key end

     0   :  { %v585_v3 = vmov 0.0|0.0   ;;  %vm586_vm0 = vmmov 0   ;;  %v587_v6 = vmov 0.0   ;;  %s697_s0 = inlined_call_operand.vmem [shape: f32[4,128], index: 0, kind: input, shape index: {}]   ;;  %s698_s1 = inlined_call_operand.vmem [shape: f32[1,128], index: 1, kind: input, shape index: {}]   ;;  %s699_s2 = inlined_call_operand.vmem [shape: f32[1,128], index: 2, kind: input, shape index: {}]   ;;  %s700_s3 = inlined_call_operand.vmem [shape: f32[128,4], index: 3, kind: input, shape index: {}]   ;;  %s701_s4 = inlined_call_operand.vmem [shape: f32[4,128], index: 4, kind: input, shape index: {}]   ;;  %s702_s5 = inlined_call_operand.hbm [shape: f32[4,128], index: 5, kind: output, shape index: {}]  }
   0x1   :  { %v22_v0 = vld [vmem:[%s700_s3] sm:$0xff]  ;;  %v23_v1 = vld [vmem:[%s700_s3 + $0x8] sm:$0xff]  ;;  %v24_v2 = vld [vmem:[%s700_s3 + $0x10] sm:$0xff]  ;;  %505 = vmatprep.subr.bf16.mxu0 %v585_v3  ;;  %529 = vmatprep.subr.bf16.mxu1 %v585_v3 }
   0x2   :  { %v506_v4 = vpack.c.bf16 %v23_v1, %v22_v0  ;;  %v25_v5 = vld [vmem:[%s700_s3 + $0x18] sm:$0xff]  ;;  %457 = vmatprep.mubr.msk.f32.mxu0 %vm586_vm0, %v587_v6  ;;  %492 = vmatprep.mubr.msk.f32.mxu1 %vm586_vm0, %v587_v6  ;;  %v26_v8 = vld [vmem:[%s700_s3 + $0x20] sm:$0xff]  ;;  %v27_v9 = vld [vmem:[%s700_s3 + $0x28] sm:$0xff] }
   0x3   :  { %v509_v7 = vpack.c.bf16 %v25_v5, %v24_v2 }
   0x4   :  { %507 = vmatpush3.bf16.msra.mxu0 %v506_v4  ;;  %531 = vmatpush3.bf16.msra.mxu1 %v506_v4 }
   0x5   :  { %508 = vmatprep.subr.bf16.mxu0 %v585_v3  ;;  %532 = vmatprep.subr.bf16.mxu1 %v585_v3 }
   0x6   :  { %10 = vsyncpa [#allocation3], 0  ;;  %v512_v10 = vpack.c.bf16 %v27_v9, %v26_v8  ;;  %v28_v11 = vld [vmem:[%s700_s3 + $0x30] sm:$0xff]  ;;  %v29_v12 = vld [vmem:[%s700_s3 + $0x38] sm:$0xff]  ;;  %vm201_vm1 = vcmask 1043456   ;;  %vm197_vm2 = vcmask 31744  }
   0x7   :  { %v515_v13 = vpack.c.bf16 %v29_v12, %v28_v11  ;;  %v30_v14 = vld [vmem:[%s700_s3 + $0x40] sm:$0xff]  ;;  %v31_v15 = vld [vmem:[%s700_s3 + $0x48] sm:$0xff]  ;;  %v32_v17 = vld [vmem:[%s700_s3 + $0x50] sm:$0xff]  ;;  %s588_s30 = smov [#allocation2]  }
   0x8   :  { %510 = vmatpush3.bf16.msra.mxu0 %v509_v7  ;;  %534 = vmatpush3.bf16.msra.mxu1 %v509_v7  ;;  %v518_v16 = vpack.c.bf16 %v31_v15, %v30_v14  ;;  %v33_v18 = vld [vmem:[%s700_s3 + $0x58] sm:$0xff]  ;;  %v34_v20 = vld [vmem:[%s700_s3 + $0x60] sm:$0xff]  ;;  %v35_v21 = vld [vmem:[%s700_s3 + $0x68] sm:$0xff]  ;;  %s373_s6 = sshll.u32 %s588_s30, 4  ;;  %s374_s6 = int_to_ptr.vmem [resolvable:$true] %s373_s6 }
   0x9   :  { %511 = vmatprep.subr.bf16.mxu0 %v585_v3  ;;  %535 = vmatprep.subr.bf16.mxu1 %v585_v3  ;;  %v521_v19 = vpack.c.bf16 %v33_v18, %v32_v17  ;;  %v524_v22 = vpack.c.bf16 %v35_v21, %v34_v20  ;;  %v36_v23 = vld [vmem:[%s700_s3 + $0x70] sm:$0xff]  ;;  %v37_v24 = vld [vmem:[%s700_s3 + $0x78] sm:$0xff]  ;;  %v21_v26 = vld [vmem:[%s697_s0] sm:$0xf]  ;;  %s561_s7 = scalar_lea.vmem %s374_s6, 64  ;;  %p566_p1 = scmp.lt.s32.totalorder %s374_s6, %s374_s6 }
   0xa   :  { %v527_v25 = vpack.c.bf16 %v37_v24, %v36_v23  ;;  %v108_v27 = vmul.f32 %v21_v26, %v21_v26  ;;  %v196_v28 = vld [vmem:[%s701_s4] sm:$0xf]  ;;  %p562_p0 = scmp.ne.s32.totalorder %s374_s6, %s561_s7  ;;  %p567_p2 = scmp.lt.s32.totalorder %s561_s7, %s561_s7 }
   0xb   :  { %v385_v52 = vld [vmem:[%s698_s1] ss:$0 sm:$0xff] }
   0xc   :  { %513 = vmatpush3.bf16.msra.mxu0 %v512_v10  ;;  %537 = vmatpush3.bf16.msra.mxu1 %v512_v10  ;;  %v386_v55 = vld [vmem:[%s699_s2] ss:$0 sm:$0xff]  ;;  %p568_p3 = por %p567_p2, %p566_p1 }
   0xd   :  { %514 = vmatprep.subr.bf16.mxu0 %v585_v3  ;;  %538 = vmatprep.subr.bf16.mxu1 %v585_v3 }
   0xe   :  { %p569_p4 = pnand %p568_p3, %p562_p0 }
  0x10   :  { %516 = vmatpush3.bf16.msra.mxu0 %v515_v13  ;;  %540 = vmatpush3.bf16.msra.mxu1 %v515_v13 }
  0x11   :  { %517 = vmatprep.subr.bf16.mxu0 %v585_v3  ;;  %541 = vmatprep.subr.bf16.mxu1 %v585_v3 }
  0x14   :  { %519 = vmatpush3.bf16.msra.mxu0 %v518_v16  ;;  %543 = vmatpush3.bf16.msra.mxu1 %v518_v16 }
  0x15   :  { %520 = vmatprep.subr.bf16.mxu0 %v585_v3  ;;  %544 = vmatprep.subr.bf16.mxu1 %v585_v3 }
  0x18   :  { %522 = vmatpush3.bf16.msra.mxu0 %v521_v19  ;;  %546 = vmatpush3.bf16.msra.mxu1 %v521_v19 }
  0x19   :  { %523 = vmatprep.subr.bf16.mxu0 %v585_v3  ;;  %547 = vmatprep.subr.bf16.mxu1 %v585_v3 }
  0x1c   :  { %525 = vmatpush3.bf16.msra.mxu0 %v524_v22  ;;  %549 = vmatpush3.bf16.msra.mxu1 %v524_v22 }
  0x1d   :  { %526 = vmatprep.subr.bf16.mxu0 %v585_v3  ;;  %550 = vmatprep.subr.bf16.mxu1 %v585_v3 }
  0x20   :  { %528 = vmatpush3.bf16.msra.mxu0 %v527_v25  ;;  %552 = vmatpush3.bf16.msra.mxu1 %v527_v25 }
  0x21   :  { %495 = vmatprep.subr.mxu0 %v587_v6  ;;  %500 = vmatprep.subr.mxu1 %v587_v6 }
  0x23   :  { %458 = vmatmul.mubr.f32.vlgmr.msra.gmra.mrb[0].mxu0 %v21_v26  ;;  %493 = vmatmul.mubr.f32.vlgmr.msra.gmra.mrb[0].mxu1 %v108_v27 }
  0x24   :  { %497 = vmatprep.mubr.msk.f32.mxu0 %vm586_vm0, %v587_v6  ;;  %502 = vmatprep.mubr.msk.f32.mxu1 %vm586_vm0, %v587_v6 }
  0x25   :  { %496 = vmatpush3.msk.msra.mxu0 %vm201_vm1, %v196_v28  ;;  %501 = vmatpush3.msk.msra.mxu1 %vm201_vm1, %v196_v28 }
  0xf6   :  { %v104_v29 = vpop.f32.mrb[0].mxu0  ;;  %v175_v30 = vpop.f32.mrb[0].mxu1 }
  0xf7   :  { %v179_v31 = vmul.f32 0.03125, %v104_v29  ;;  %v459_v32 = vpop.f32.mrb[1].mxu0  ;;  %v494_v33 = vpop.f32.mrb[1].mxu1 }
  0xf9   :  { %v180_v34 = vmul.f32 %v179_v31, %v104_v29  ;;  %498 = vmatmul.mubr.msk.f32.vlgmr.msra.gmra.mrb[2].mxu0 %vm197_vm2, %v179_v31 }
  0xfb   :  { %v181_v35 = vsub.f32 %v175_v30, %v180_v34 }
  0xfd   :  { %v182_v36 = vmax.f32 %v181_v35, 0.0 }
  0xff   :  { %v183_v37 = vmul.f32 0.032258064, %v182_v36 }
 0x101   :  { %557 = vrsqrt.f32 %v183_v37  ;;  %vm186_vm3 = vcmp.eq.f32.partialorder %v183_v37, inf  ;;  %v189_v40 = vand.u32 2147483648, %v183_v37  ;;  %vm188_vm4 = vcmp.eq.f32.partialorder %v183_v37, 0.0 }
 0x10b   :  { %v558_v38 = vpop.eup %557 }
 0x10c   :  { %v185_v39 = vmul.f32 %v558_v38, %v183_v37 }
 0x10e   :  { %v187_v41 = vsel %vm186_vm3, %v183_v37, %v185_v39 }
 0x10f   :  { %v190_v42 = vsel %vm188_vm4, %v189_v40, %v187_v41 }
 0x110   :  { %v191_v43 = vadd.f32 1e-06, %v190_v42 }
 0x112   :  { %559 = vrcp.f32 %v191_v43 }
 0x11c   :  { %v560_v44 = vpop.eup %559 }
 0x11d   :  { %v193_v45 = vmul.f32 %v560_v44, %v191_v43 }
 0x11f   :  { %v194_v46 = vsub.f32 2.0, %v193_v45 }
 0x121   :  { %v195_v47 = vmul.f32 %v560_v44, %v194_v46 }
 0x123   :  { %503 = vmatmul.mubr.msk.f32.vlgmr.msra.gmra.mrb[2].mxu1 %vm197_vm2, %v195_v47 }
 0x1cc   :  { %v271_v48 = vpop.f32.mrb[2].mxu0 }
 0x1cd   :  { %v499_v49 = vpop.f32.mrb[3].mxu0  ;;  %v348_v50 = vsub.f32 %v21_v26, %v271_v48 }
 0x1f6   :  { %v344_v51 = vpop.f32.mrb[2].mxu1 }
 0x1f7   :  { %v349_v53 = vmul.f32 %v348_v50, %v344_v51  ;;  %v504_v54 = vpop.f32.mrb[3].mxu1 }
 0x1f9   :  { %v357_v56 = vmul.f32 %v385_v52, %v349_v53 }
 0x1fb   :  { %v365_v57 = vadd.f32 %v386_v55, %v357_v56 }
 0x1fd   :  { %366 = vst [vmem:[#allocation2] sm:$0xf] %v365_v57 }
 0x1fe   :  { %572 = shalt.err (!%p569_p4)
}
 0x1ff   :  { %s573_s9 = scalar_lea.hbm %s702_s5, 64 }
 0x200   :  { %p574_p5 = scmp.ne.s32.totalorder %s702_s5, %s573_s9  ;;  %p577_p6 = scmp.lt.u32.totalorder %s573_s9, %s702_s5 }
 0x202   :  { %p579_p7 = pnand %p577_p6, %p574_p5 }
 0x204   :  { %582 = shalt.err (!%p579_p7)
}
 0x205   :  { %376 = dma.vmem_to_hbm [thread:$0]  %s374_s6, 64, %s702_s5, [#allocation3]  }
 0x206   :  { %583 = dma.done.wait [#allocation3], 64  }
 0x207   :  { %584 = vsyncadd [#allocation3], 4294967232 }
 0x208   :  { %380 = vsyncpa [#allocation3], 1 }

</bundles_post_ra>
